<compile_context>
chip_gen: v5e
topology: v5e:2x2
jax: 0.10.0
libtpu: 0.0.40
codegen_flags: <defaults>
</compile_context>

<pallas_src>
from __future__ import annotations

import functools

import numpy as np

import jax
import jax.numpy as jnp
from jax.experimental import pallas as pl
from jax.experimental.pallas import tpu as pltpu


_LN_EPS = 1e-5
_T_NAMES = ("t_b1c1", "t_b1c2", "t_sc1", "t_b2c1", "t_b2c2", "t_sc2",
            "t_b3c1", "t_b3c2", "t_sc3")


def _round_up(x, m):
    return ((x + m - 1) // m) * m


# ----------------------------- Pallas kernel --------------------------------

def _resnet_fused_kernel(
    x_ref,
    t_b1c1, t_b1c2, t_sc1, t_b2c1, t_b2c2, t_sc2, t_b3c1, t_b3c2, t_sc3,
    shifts_ref, fcw_ref,
    o_ref,
):
    """Whole network (9 convs + residual adds + FC) for one batch tile."""

    def conv_bn(h, t_ref, row, relu):
        # bf16 MXU matmul, f32 accumulate, f32 epilogue (+shift, ReLU).
        y = jnp.dot(h.astype(jnp.bfloat16), t_ref[...],
                    preferred_element_type=jnp.float32)
        y = y + shifts_ref[row:row + 1, :t_ref.shape[1]]
        return jnp.maximum(y, 0.0) if relu else y

    x = x_ref[...]                                  # (W*tile_b, K0_pad)

    # Block1 + shortcut1 (ReLU inside the block, residual add after, no ReLU
    # after the add -- exactly as in the PyTorch reference).
    h = conv_bn(x, t_b1c1, 0, relu=True)
    h = conv_bn(h, t_b1c2, 1, relu=True)
    h = h + conv_bn(x, t_sc1, 2, relu=False)

    # Block2 + shortcut2
    h2 = conv_bn(h, t_b2c1, 3, relu=True)
    h2 = conv_bn(h2, t_b2c2, 4, relu=True)
    h = h2 + conv_bn(h, t_sc2, 5, relu=False)

    # Block3 + shortcut3
    h3 = conv_bn(h, t_b3c1, 6, relu=True)
    h3 = conv_bn(h3, t_b3c2, 7, relu=True)
    h = h3 + conv_bn(h, t_sc3, 8, relu=False)

    # Final Linear: mixes the W channel groups of one example -> sum per-group
    # matmuls over the contiguous per-group row slabs (rows are (w, b) major).
    n_groups = fcw_ref.shape[0]
    tile_b = o_ref.shape[0]
    nc_pad = o_ref.shape[1]
    acc = jnp.dot(h[0:tile_b, :].astype(jnp.bfloat16), fcw_ref[0],
                  preferred_element_type=jnp.float32)
    for g in range(1, n_groups):
        hg = h[g * tile_b:(g + 1) * tile_b, :]
        acc = acc + jnp.dot(hg.astype(jnp.bfloat16), fcw_ref[g],
                            preferred_element_type=jnp.float32)
    bias_row = shifts_ref.shape[0] - 1
    o_ref[...] = acc + shifts_ref[bias_row:bias_row + 1, :nc_pad]


# -------------------------------- wrapper ------------------------------------

def _pick_batch_tile(batch):
    # tile_b always a multiple of 8 (sublane packing); >=2 grid steps once the
    # batch is big enough so both v7x TensorCores get work; capped so tiles
    # stay far inside VMEM (weights + activations here are <1 MiB per tile).
    if batch <= 8:
        return 8
    if batch <= 16:
        return 16
    return min(256, _round_up(-(-batch // 2), 16))


def resnet_forward(x, params, *, num_classes):
    """x: (B, window_len, num_channels) float32 -> (B, num_classes) float32."""
    b, seq_len, n_ch = x.shape
    k0_pad = params["t_b1c1"].shape[0]
    nc_pad = params["fcw"].shape[2]

    tile_b = _pick_batch_tile(b)
    num_tiles = -(-b // tile_b)
    b_pad = num_tiles * tile_b
    rows_per_tile = n_ch * tile_b

    # Layout plumbing (wrapper-side, cheap): (B, L, W) -> per-tile row blocks
    # ordered (w_group, example), length axis zero-padded to a lane multiple.
    xt = jnp.transpose(x, (0, 2, 1))                                # (B, W, L)
    xt = jnp.pad(xt, ((0, b_pad - b), (0, 0), (0, k0_pad - seq_len)))
    xt = xt.reshape(num_tiles, tile_b, n_ch, k0_pad)
    xt = jnp.transpose(xt, (0, 2, 1, 3)).reshape(num_tiles * rows_per_tile, k0_pad)

    t_args = [params[n] for n in _T_NAMES]
    in_specs = [pl.BlockSpec((rows_per_tile, k0_pad), lambda i: (i, 0))]
    in_specs += [pl.BlockSpec(tm.shape, lambda i: (0, 0)) for tm in t_args]
    in_specs += [pl.BlockSpec(params["shifts"].shape, lambda i: (0, 0)),
                 pl.BlockSpec(params["fcw"].shape, lambda i: (0, 0, 0))]

    out = pl.pallas_call(
        _resnet_fused_kernel,
        out_shape=jax.ShapeDtypeStruct((b_pad, nc_pad), jnp.float32),
        grid=(num_tiles,),
        in_specs=in_specs,
        out_specs=pl.BlockSpec((tile_b, nc_pad), lambda i: (i, 0)),
        compiler_params=pltpu.CompilerParams(
            dimension_semantics=("parallel",),       # batch tiles shard across TCs
            vmem_limit_bytes=32 * 1024 * 1024,       # usage is well under 1 MiB
        ),
    )(xt, *t_args, params["shifts"], params["fcw"])

    logits = out[:b, :num_classes]
    # nn.LayerNorm(out.size()) on a fresh module: gamma=1, beta=0, eps=1e-5,
    # statistics over the WHOLE (B, num_classes) tensor.  Done in the wrapper
    # with plain jnp (per perf review) instead of a second pallas_call.
    mean = jnp.mean(logits)
    var = jnp.mean((logits - mean) ** 2)
    return (logits - mean) * jax.lax.rsqrt(var + _LN_EPS)


# ----------------------------- parameter init --------------------------------

def _init_conv_bn_folded(key, cin, cout, kh):
    """Random Conv2d(k,1)+BatchNorm2d with BN folded (eval mode)."""
    k1, k2, k3, k4, k5, k6 = jax.random.split(key, 6)
    w = 0.1 * jax.random.normal(k1, (cout, cin, kh), jnp.float32)
    b = 0.1 * jax.random.normal(k2, (cout,), jnp.float32)
    gamma = 1.0 + 0.1 * jax.random.normal(k3, (cout,), jnp.float32)
    beta = 0.1 * jax.random.normal(k4, (cout,), jnp.float32)
    rmean = 0.1 * jax.random.normal(k5, (cout,), jnp.float32)
    rvar = 1.0 + 0.1 * jnp.abs(jax.random.normal(k6, (cout,), jnp.float32))
    scale = gamma / jnp.sqrt(rvar + 1e-5)
    shift = (b - rmean) * scale + beta
    w_eff = w * scale[:, None, None]
    return np.asarray(w_eff), np.asarray(shift)


def _conv_matrix(w_eff, l_in, stride, pad):
    """Dense per-group (L_in*Cin, L_out*Cout) matrix for a (k,1)/(s,1)/(p,0) conv."""
    cout, cin, kh = w_eff.shape
    l_out = (l_in + 2 * pad - kh) // stride + 1
    t = np.zeros((l_in * cin, l_out * cout), np.float32)
    for i in range(l_out):
        for tap in range(kh):
            src = i * stride + tap - pad
            if 0 <= src < l_in:
                t[src * cin:(src + 1) * cin, i * cout:(i + 1) * cout] += w_eff[:, :, tap].T
    return t, l_out


def _make_layer(key, cin, cout, kh, stride, pad, l_in, k_in_pad):
    """One folded Conv+BN layer: 128-padded dense matrix + 128-padded shift row."""
    w_eff, shift = _init_conv_bn_folded(key, cin, cout, kh)
    t_seq, l_out = _conv_matrix(w_eff, l_in, stride, pad)
    n_out = l_out * cout
    n_out_pad = _round_up(n_out, 128)
    t_full = np.zeros((k_in_pad, n_out_pad), np.float32)
    t_full[:l_in * cin, :n_out] = t_seq
    s_full = np.zeros((n_out_pad,), np.float32)
    s_full[:n_out] = np.tile(shift, l_out)            # (l, c) order, c minor
    return t_full, s_full, l_out, n_out_pad


def init_params(key, window_len, num_channels, num_classes, out_channels):
    c1, c2, c3 = out_channels, out_channels * 2, out_channels * 4
    keys = jax.random.split(key, 10)
    k0_pad = _round_up(window_len * 1, 128)           # Cin = 1 per group

    t, s = {}, {}
    t["t_b1c1"], s["t_b1c1"], l1a, a1 = _make_layer(keys[0], 1, c1, 6, 3, 1, window_len, k0_pad)
    t["t_b1c2"], s["t_b1c2"], l1, a1 = _make_layer(keys[1], c1, c1, 3, 1, 1, l1a, a1)
    t["t_sc1"], s["t_sc1"], _, _ = _make_layer(keys[2], 1, c1, 6, 3, 1, window_len, k0_pad)
    t["t_b2c1"], s["t_b2c1"], l2a, a2 = _make_layer(keys[3], c1, c2, 6, 3, 1, l1, a1)
    t["t_b2c2"], s["t_b2c2"], l2, a2 = _make_layer(keys[4], c2, c2, 3, 1, 1, l2a, a2)
    t["t_sc2"], s["t_sc2"], _, _ = _make_layer(keys[5], c1, c2, 6, 3, 1, l1, a1)
    t["t_b3c1"], s["t_b3c1"], l3a, a3 = _make_layer(keys[6], c2, c3, 3, 3, 1, l2, a2)
    t["t_b3c2"], s["t_b3c2"], l3, a3 = _make_layer(keys[7], c3, c3, 3, 1, 1, l3a, a3)
    t["t_sc3"], s["t_sc3"], _, _ = _make_layer(keys[8], c2, c3, 3, 3, 1, l2, a2)

    # Final Linear.  Generate in PyTorch flatten order (c, l, w) then split
    # into per-w-group (K3_pad, NC_pad) matrices matching this kernel's
    # (l, c) per-group column layout.  NC is lane-padded to 128.
    nc_pad = _round_up(num_classes, 128)
    kf1, kf2 = jax.random.split(keys[9])
    fc_in = l3 * c3 * num_channels
    fc_w_pt = np.asarray(0.05 * jax.random.normal(kf1, (fc_in, num_classes), jnp.float32))
    fc_b = np.asarray(0.05 * jax.random.normal(kf2, (num_classes,), jnp.float32))
    fcw = np.zeros((num_channels, a3, nc_pad), np.float32)
    for w in range(num_channels):
        for l in range(l3):
            for c in range(c3):
                fcw[w, l * c3 + c, :num_classes] = \
                    fc_w_pt[c * (l3 * num_channels) + l * num_channels + w, :]

    # Pack the 9 conv shift rows + the FC bias into ONE (10, width) array.
    widths = [s[n].shape[0] for n in _T_NAMES] + [nc_pad]
    max_w = max(widths)
    shifts = np.zeros((len(_T_NAMES) + 1, max_w), np.float32)
    for idx, n in enumerate(_T_NAMES):
        shifts[idx, :s[n].shape[0]] = s[n]
    shifts[len(_T_NAMES), :num_classes] = fc_b

    params = {n: jnp.asarray(t[n], jnp.bfloat16) for n in _T_NAMES}
    params["shifts"] = jnp.asarray(shifts, jnp.float32)
    params["fcw"] = jnp.asarray(fcw, jnp.bfloat16)
    return params


# --------------------------------- main ---------------------------------------

if __name__ == "__main__":
    batch = 2
    window_len = 50
    num_channels = 3
    num_classes = 5
    out_channels = 8

    key = jax.random.PRNGKey(0)
    kx, kp = jax.random.split(key)
    x = jax.random.normal(kx, (batch, window_len, num_channels), jnp.float32)
    params = init_params(kp, window_len, num_channels, num_classes, out_channels)

    fwd = jax.jit(functools.partial(resnet_forward, num_classes=num_classes))
    out = jax.block_until_ready(fwd(x, params))
    assert out.shape == (batch, num_classes), out.shape
    assert bool(jnp.all(jnp.isfinite(out)))
    print("KERNEL_OK")
</pallas_src>

<mosaic_0001>
module attributes {stable_mosaic.version = 11 : i64} {
  func.func @_resnet_fused_kernel(%arg0: i32, %arg1: memref<24x128xf32, #tpu.memory_space<vmem>>, %arg2: memref<128x128xbf16, #tpu.memory_space<vmem>>, %arg3: memref<128x128xbf16, #tpu.memory_space<vmem>>, %arg4: memref<128x128xbf16, #tpu.memory_space<vmem>>, %arg5: memref<128x128xbf16, #tpu.memory_space<vmem>>, %arg6: memref<128x128xbf16, #tpu.memory_space<vmem>>, %arg7: memref<128x128xbf16, #tpu.memory_space<vmem>>, %arg8: memref<128x128xbf16, #tpu.memory_space<vmem>>, %arg9: memref<128x128xbf16, #tpu.memory_space<vmem>>, %arg10: memref<128x128xbf16, #tpu.memory_space<vmem>>, %arg11: memref<10x128xf32, #tpu.memory_space<vmem>>, %arg12: memref<3x128x128xbf16, #tpu.memory_space<vmem>>, %arg13: memref<8x128xf32, #tpu.memory_space<vmem>>) attributes {dimension_semantics = [#tpu.dimension_semantics<parallel>], iteration_bounds = array<i64: 1>, scalar_prefetch = 0 : i64, scratch_operands = 0 : i64, tpu.core_type = #tpu.core_type<tc>, window_params = [{transform_indices = @transform_0, window_bounds = array<i64: 24, 128>}, {pipeline_mode = #tpu.pipeline_mode<synchronous>, transform_indices = @transform_1, window_bounds = array<i64: 128, 128>}, {pipeline_mode = #tpu.pipeline_mode<synchronous>, transform_indices = @transform_2, window_bounds = array<i64: 128, 128>}, {pipeline_mode = #tpu.pipeline_mode<synchronous>, transform_indices = @transform_3, window_bounds = array<i64: 128, 128>}, {pipeline_mode = #tpu.pipeline_mode<synchronous>, transform_indices = @transform_4, window_bounds = array<i64: 128, 128>}, {pipeline_mode = #tpu.pipeline_mode<synchronous>, transform_indices = @transform_5, window_bounds = array<i64: 128, 128>}, {pipeline_mode = #tpu.pipeline_mode<synchronous>, transform_indices = @transform_6, window_bounds = array<i64: 128, 128>}, {pipeline_mode = #tpu.pipeline_mode<synchronous>, transform_indices = @transform_7, window_bounds = array<i64: 128, 128>}, {pipeline_mode = #tpu.pipeline_mode<synchronous>, transform_indices = @transform_8, window_bounds = array<i64: 128, 128>}, {pipeline_mode = #tpu.pipeline_mode<synchronous>, transform_indices = @transform_9, window_bounds = array<i64: 128, 128>}, {pipeline_mode = #tpu.pipeline_mode<synchronous>, transform_indices = @transform_10, window_bounds = array<i64: 10, 128>}, {pipeline_mode = #tpu.pipeline_mode<synchronous>, transform_indices = @transform_11, window_bounds = array<i64: 3, 128, 128>}, {transform_indices = @transform_12, window_bounds = array<i64: 8, 128>}]} {
    %c0 = arith.constant 0 : index
    %c0_0 = arith.constant 0 : index
    %0 = vector.load %arg1[%c0, %c0_0] : memref<24x128xf32, #tpu.memory_space<vmem>>, vector<24x128xf32>
    %1 = arith.truncf %0 : vector<24x128xf32> to vector<24x128xbf16>
    %c0_1 = arith.constant 0 : index
    %c0_2 = arith.constant 0 : index
    %2 = vector.load %arg2[%c0_1, %c0_2] : memref<128x128xbf16, #tpu.memory_space<vmem>>, vector<128x128xbf16>
    %cst = arith.constant dense<0.000000e+00> : vector<24x128xf32>
    %3 = tpu.matmul %1, %2, %cst {dimension_numbers = #tpu.dot_dimension_numbers<[1], [0], [0], [1], [0, 0, 1, 1], [], []>} : vector<24x128xbf16>, vector<128x128xbf16>, vector<24x128xf32> -> vector<24x128xf32>
    %c0_3 = arith.constant 0 : index
    %c0_4 = arith.constant 0 : index
    %4 = vector.load %arg11[%c0_3, %c0_4] : memref<10x128xf32, #tpu.memory_space<vmem>>, vector<1x128xf32>
    %5 = vector.broadcast %4 : vector<1x128xf32> to vector<24x128xf32>
    %6 = arith.addf %3, %5 : vector<24x128xf32>
    %cst_5 = arith.constant 0.000000e+00 : f32
    %7 = vector.broadcast %cst_5 : f32 to vector<24x128xf32>
    %8 = arith.maximumf %6, %7 : vector<24x128xf32>
    %9 = arith.truncf %8 : vector<24x128xf32> to vector<24x128xbf16>
    %c0_6 = arith.constant 0 : index
    %c0_7 = arith.constant 0 : index
    %10 = vector.load %arg3[%c0_6, %c0_7] : memref<128x128xbf16, #tpu.memory_space<vmem>>, vector<128x128xbf16>
    %cst_8 = arith.constant dense<0.000000e+00> : vector<24x128xf32>
    %11 = tpu.matmul %9, %10, %cst_8 {dimension_numbers = #tpu.dot_dimension_numbers<[1], [0], [0], [1], [0, 0, 1, 1], [], []>} : vector<24x128xbf16>, vector<128x128xbf16>, vector<24x128xf32> -> vector<24x128xf32>
    %c1 = arith.constant 1 : index
    %c0_9 = arith.constant 0 : index
    %12 = vector.load %arg11[%c1, %c0_9] : memref<10x128xf32, #tpu.memory_space<vmem>>, vector<1x128xf32>
    %13 = vector.broadcast %12 : vector<1x128xf32> to vector<24x128xf32>
    %14 = arith.addf %11, %13 : vector<24x128xf32>
    %cst_10 = arith.constant 0.000000e+00 : f32
    %15 = vector.broadcast %cst_10 : f32 to vector<24x128xf32>
    %16 = arith.maximumf %14, %15 : vector<24x128xf32>
    %17 = arith.truncf %0 : vector<24x128xf32> to vector<24x128xbf16>
    %c0_11 = arith.constant 0 : index
    %c0_12 = arith.constant 0 : index
    %18 = vector.load %arg4[%c0_11, %c0_12] : memref<128x128xbf16, #tpu.memory_space<vmem>>, vector<128x128xbf16>
    %cst_13 = arith.constant dense<0.000000e+00> : vector<24x128xf32>
    %19 = tpu.matmul %17, %18, %cst_13 {dimension_numbers = #tpu.dot_dimension_numbers<[1], [0], [0], [1], [0, 0, 1, 1], [], []>} : vector<24x128xbf16>, vector<128x128xbf16>, vector<24x128xf32> -> vector<24x128xf32>
    %c2 = arith.constant 2 : index
    %c0_14 = arith.constant 0 : index
    %20 = vector.load %arg11[%c2, %c0_14] : memref<10x128xf32, #tpu.memory_space<vmem>>, vector<1x128xf32>
    %21 = vector.broadcast %20 : vector<1x128xf32> to vector<24x128xf32>
    %22 = arith.addf %19, %21 : vector<24x128xf32>
    %23 = arith.addf %16, %22 : vector<24x128xf32>
    %24 = arith.truncf %23 : vector<24x128xf32> to vector<24x128xbf16>
    %c0_15 = arith.constant 0 : index
    %c0_16 = arith.constant 0 : index
    %25 = vector.load %arg5[%c0_15, %c0_16] : memref<128x128xbf16, #tpu.memory_space<vmem>>, vector<128x128xbf16>
    %cst_17 = arith.constant dense<0.000000e+00> : vector<24x128xf32>
    %26 = tpu.matmul %24, %25, %cst_17 {dimension_numbers = #tpu.dot_dimension_numbers<[1], [0], [0], [1], [0, 0, 1, 1], [], []>} : vector<24x128xbf16>, vector<128x128xbf16>, vector<24x128xf32> -> vector<24x128xf32>
    %c3 = arith.constant 3 : index
    %c0_18 = arith.constant 0 : index
    %27 = vector.load %arg11[%c3, %c0_18] : memref<10x128xf32, #tpu.memory_space<vmem>>, vector<1x128xf32>
    %28 = vector.broadcast %27 : vector<1x128xf32> to vector<24x128xf32>
    %29 = arith.addf %26, %28 : vector<24x128xf32>
    %cst_19 = arith.constant 0.000000e+00 : f32
    %30 = vector.broadcast %cst_19 : f32 to vector<24x128xf32>
    %31 = arith.maximumf %29, %30 : vector<24x128xf32>
    %32 = arith.truncf %31 : vector<24x128xf32> to vector<24x128xbf16>
    %c0_20 = arith.constant 0 : index
    %c0_21 = arith.constant 0 : index
    %33 = vector.load %arg6[%c0_20, %c0_21] : memref<128x128xbf16, #tpu.memory_space<vmem>>, vector<128x128xbf16>
    %cst_22 = arith.constant dense<0.000000e+00> : vector<24x128xf32>
    %34 = tpu.matmul %32, %33, %cst_22 {dimension_numbers = #tpu.dot_dimension_numbers<[1], [0], [0], [1], [0, 0, 1, 1], [], []>} : vector<24x128xbf16>, vector<128x128xbf16>, vector<24x128xf32> -> vector<24x128xf32>
    %c4 = arith.constant 4 : index
    %c0_23 = arith.constant 0 : index
    %35 = vector.load %arg11[%c4, %c0_23] : memref<10x128xf32, #tpu.memory_space<vmem>>, vector<1x128xf32>
    %36 = vector.broadcast %35 : vector<1x128xf32> to vector<24x128xf32>
    %37 = arith.addf %34, %36 : vector<24x128xf32>
    %cst_24 = arith.constant 0.000000e+00 : f32
    %38 = vector.broadcast %cst_24 : f32 to vector<24x128xf32>
    %39 = arith.maximumf %37, %38 : vector<24x128xf32>
    %40 = arith.truncf %23 : vector<24x128xf32> to vector<24x128xbf16>
    %c0_25 = arith.constant 0 : index
    %c0_26 = arith.constant 0 : index
    %41 = vector.load %arg7[%c0_25, %c0_26] : memref<128x128xbf16, #tpu.memory_space<vmem>>, vector<128x128xbf16>
    %cst_27 = arith.constant dense<0.000000e+00> : vector<24x128xf32>
    %42 = tpu.matmul %40, %41, %cst_27 {dimension_numbers = #tpu.dot_dimension_numbers<[1], [0], [0], [1], [0, 0, 1, 1], [], []>} : vector<24x128xbf16>, vector<128x128xbf16>, vector<24x128xf32> -> vector<24x128xf32>
    %c5 = arith.constant 5 : index
    %c0_28 = arith.constant 0 : index
    %43 = vector.load %arg11[%c5, %c0_28] : memref<10x128xf32, #tpu.memory_space<vmem>>, vector<1x128xf32>
    %44 = vector.broadcast %43 : vector<1x128xf32> to vector<24x128xf32>
    %45 = arith.addf %42, %44 : vector<24x128xf32>
    %46 = arith.addf %39, %45 : vector<24x128xf32>
    %47 = arith.truncf %46 : vector<24x128xf32> to vector<24x128xbf16>
    %c0_29 = arith.constant 0 : index
    %c0_30 = arith.constant 0 : index
    %48 = vector.load %arg8[%c0_29, %c0_30] : memref<128x128xbf16, #tpu.memory_space<vmem>>, vector<128x128xbf16>
    %cst_31 = arith.constant dense<0.000000e+00> : vector<24x128xf32>
    %49 = tpu.matmul %47, %48, %cst_31 {dimension_numbers = #tpu.dot_dimension_numbers<[1], [0], [0], [1], [0, 0, 1, 1], [], []>} : vector<24x128xbf16>, vector<128x128xbf16>, vector<24x128xf32> -> vector<24x128xf32>
    %c6 = arith.constant 6 : index
    %c0_32 = arith.constant 0 : index
    %50 = vector.load %arg11[%c6, %c0_32] : memref<10x128xf32, #tpu.memory_space<vmem>>, vector<1x128xf32>
    %51 = vector.broadcast %50 : vector<1x128xf32> to vector<24x128xf32>
    %52 = arith.addf %49, %51 : vector<24x128xf32>
    %cst_33 = arith.constant 0.000000e+00 : f32
    %53 = vector.broadcast %cst_33 : f32 to vector<24x128xf32>
    %54 = arith.maximumf %52, %53 : vector<24x128xf32>
    %55 = arith.truncf %54 : vector<24x128xf32> to vector<24x128xbf16>
    %c0_34 = arith.constant 0 : index
    %c0_35 = arith.constant 0 : index
    %56 = vector.load %arg9[%c0_34, %c0_35] : memref<128x128xbf16, #tpu.memory_space<vmem>>, vector<128x128xbf16>
    %cst_36 = arith.constant dense<0.000000e+00> : vector<24x128xf32>
    %57 = tpu.matmul %55, %56, %cst_36 {dimension_numbers = #tpu.dot_dimension_numbers<[1], [0], [0], [1], [0, 0, 1, 1], [], []>} : vector<24x128xbf16>, vector<128x128xbf16>, vector<24x128xf32> -> vector<24x128xf32>
    %c7 = arith.constant 7 : index
    %c0_37 = arith.constant 0 : index
    %58 = vector.load %arg11[%c7, %c0_37] : memref<10x128xf32, #tpu.memory_space<vmem>>, vector<1x128xf32>
    %59 = vector.broadcast %58 : vector<1x128xf32> to vector<24x128xf32>
    %60 = arith.addf %57, %59 : vector<24x128xf32>
    %cst_38 = arith.constant 0.000000e+00 : f32
    %61 = vector.broadcast %cst_38 : f32 to vector<24x128xf32>
    %62 = arith.maximumf %60, %61 : vector<24x128xf32>
    %63 = arith.truncf %46 : vector<24x128xf32> to vector<24x128xbf16>
    %c0_39 = arith.constant 0 : index
    %c0_40 = arith.constant 0 : index
    %64 = vector.load %arg10[%c0_39, %c0_40] : memref<128x128xbf16, #tpu.memory_space<vmem>>, vector<128x128xbf16>
    %cst_41 = arith.constant dense<0.000000e+00> : vector<24x128xf32>
    %65 = tpu.matmul %63, %64, %cst_41 {dimension_numbers = #tpu.dot_dimension_numbers<[1], [0], [0], [1], [0, 0, 1, 1], [], []>} : vector<24x128xbf16>, vector<128x128xbf16>, vector<24x128xf32> -> vector<24x128xf32>
    %c8 = arith.constant 8 : index
    %c0_42 = arith.constant 0 : index
    %66 = vector.load %arg11[%c8, %c0_42] : memref<10x128xf32, #tpu.memory_space<vmem>>, vector<1x128xf32>
    %67 = vector.broadcast %66 : vector<1x128xf32> to vector<24x128xf32>
    %68 = arith.addf %65, %67 : vector<24x128xf32>
    %69 = arith.addf %62, %68 : vector<24x128xf32>
    %70 = vector.extract_strided_slice %69 {offsets = [0, 0], sizes = [8, 128], strides = [1, 1]} : vector<24x128xf32> to vector<8x128xf32>
    %71 = arith.truncf %70 : vector<8x128xf32> to vector<8x128xbf16>
    %c0_43 = arith.constant 0 : index
    %c0_44 = arith.constant 0 : index
    %c0_45 = arith.constant 0 : index
    %72 = vector.load %arg12[%c0_43, %c0_44, %c0_45] : memref<3x128x128xbf16, #tpu.memory_space<vmem>>, vector<1x128x128xbf16>
    %73 = vector.shape_cast %72 : vector<1x128x128xbf16> to vector<128x128xbf16>
    %cst_46 = arith.constant dense<0.000000e+00> : vector<8x128xf32>
    %74 = tpu.matmul %71, %73, %cst_46 {dimension_numbers = #tpu.dot_dimension_numbers<[1], [0], [0], [1], [0, 0, 1, 1], [], []>} : vector<8x128xbf16>, vector<128x128xbf16>, vector<8x128xf32> -> vector<8x128xf32>
    %75 = vector.extract_strided_slice %69 {offsets = [8, 0], sizes = [8, 128], strides = [1, 1]} : vector<24x128xf32> to vector<8x128xf32>
    %76 = arith.truncf %75 : vector<8x128xf32> to vector<8x128xbf16>
    %c1_47 = arith.constant 1 : index
    %c0_48 = arith.constant 0 : index
    %c0_49 = arith.constant 0 : index
    %77 = vector.load %arg12[%c1_47, %c0_48, %c0_49] : memref<3x128x128xbf16, #tpu.memory_space<vmem>>, vector<1x128x128xbf16>
    %78 = vector.shape_cast %77 : vector<1x128x128xbf16> to vector<128x128xbf16>
    %cst_50 = arith.constant dense<0.000000e+00> : vector<8x128xf32>
    %79 = tpu.matmul %76, %78, %cst_50 {dimension_numbers = #tpu.dot_dimension_numbers<[1], [0], [0], [1], [0, 0, 1, 1], [], []>} : vector<8x128xbf16>, vector<128x128xbf16>, vector<8x128xf32> -> vector<8x128xf32>
    %80 = arith.addf %74, %79 : vector<8x128xf32>
    %81 = vector.extract_strided_slice %69 {offsets = [16, 0], sizes = [8, 128], strides = [1, 1]} : vector<24x128xf32> to vector<8x128xf32>
    %82 = arith.truncf %81 : vector<8x128xf32> to vector<8x128xbf16>
    %c2_51 = arith.constant 2 : index
    %c0_52 = arith.constant 0 : index
    %c0_53 = arith.constant 0 : index
    %83 = vector.load %arg12[%c2_51, %c0_52, %c0_53] : memref<3x128x128xbf16, #tpu.memory_space<vmem>>, vector<1x128x128xbf16>
    %84 = vector.shape_cast %83 : vector<1x128x128xbf16> to vector<128x128xbf16>
    %cst_54 = arith.constant dense<0.000000e+00> : vector<8x128xf32>
    %85 = tpu.matmul %82, %84, %cst_54 {dimension_numbers = #tpu.dot_dimension_numbers<[1], [0], [0], [1], [0, 0, 1, 1], [], []>} : vector<8x128xbf16>, vector<128x128xbf16>, vector<8x128xf32> -> vector<8x128xf32>
    %86 = arith.addf %80, %85 : vector<8x128xf32>
    %c9 = arith.constant 9 : index
    %c0_55 = arith.constant 0 : index
    %87 = vector.load %arg11[%c9, %c0_55] : memref<10x128xf32, #tpu.memory_space<vmem>>, vector<1x128xf32>
    %88 = vector.broadcast %87 : vector<1x128xf32> to vector<8x128xf32>
    %89 = arith.addf %86, %88 : vector<8x128xf32>
    %c0_56 = arith.constant 0 : index
    %c0_57 = arith.constant 0 : index
    %90 = vector.load %arg13[%c0_56, %c0_57] : memref<8x128xf32, #tpu.memory_space<vmem>>, vector<8x128xf32>
    tpu.vector_store %arg13[%c0_56, %c0_57], %89 {strides = array<i32>} : memref<8x128xf32, #tpu.memory_space<vmem>>, vector<8x128xf32>,
    return
  }
  func.func @transform_0(%arg0: i32) -> (i32, i32) {
    %c0_i32 = arith.constant 0 : i32
    %c0_i32_0 = arith.constant 0 : i32
    return %arg0, %c0_i32 : i32, i32
  }
  func.func @transform_1(%arg0: i32) -> (i32, i32) {
    %c0_i32 = arith.constant 0 : i32
    %c0_i32_0 = arith.constant 0 : i32
    %c0_i32_1 = arith.constant 0 : i32
    return %c0_i32, %c0_i32_0 : i32, i32
  }
  func.func @transform_2(%arg0: i32) -> (i32, i32) {
    %c0_i32 = arith.constant 0 : i32
    %c0_i32_0 = arith.constant 0 : i32
    %c0_i32_1 = arith.constant 0 : i32
    return %c0_i32, %c0_i32_0 : i32, i32
  }
  func.func @transform_3(%arg0: i32) -> (i32, i32) {
    %c0_i32 = arith.constant 0 : i32
    %c0_i32_0 = arith.constant 0 : i32
    %c0_i32_1 = arith.constant 0 : i32
    return %c0_i32, %c0_i32_0 : i32, i32
  }
  func.func @transform_4(%arg0: i32) -> (i32, i32) {
    %c0_i32 = arith.constant 0 : i32
    %c0_i32_0 = arith.constant 0 : i32
    %c0_i32_1 = arith.constant 0 : i32
    return %c0_i32, %c0_i32_0 : i32, i32
  }
  func.func @transform_5(%arg0: i32) -> (i32, i32) {
    %c0_i32 = arith.constant 0 : i32
    %c0_i32_0 = arith.constant 0 : i32
    %c0_i32_1 = arith.constant 0 : i32
    return %c0_i32, %c0_i32_0 : i32, i32
  }
  func.func @transform_6(%arg0: i32) -> (i32, i32) {
    %c0_i32 = arith.constant 0 : i32
    %c0_i32_0 = arith.constant 0 : i32
    %c0_i32_1 = arith.constant 0 : i32
    return %c0_i32, %c0_i32_0 : i32, i32
  }
  func.func @transform_7(%arg0: i32) -> (i32, i32) {
    %c0_i32 = arith.constant 0 : i32
    %c0_i32_0 = arith.constant 0 : i32
    %c0_i32_1 = arith.constant 0 : i32
    return %c0_i32, %c0_i32_0 : i32, i32
  }
  func.func @transform_8(%arg0: i32) -> (i32, i32) {
    %c0_i32 = arith.constant 0 : i32
    %c0_i32_0 = arith.constant 0 : i32
    %c0_i32_1 = arith.constant 0 : i32
    return %c0_i32, %c0_i32_0 : i32, i32
  }
  func.func @transform_9(%arg0: i32) -> (i32, i32) {
    %c0_i32 = arith.constant 0 : i32
    %c0_i32_0 = arith.constant 0 : i32
    %c0_i32_1 = arith.constant 0 : i32
    return %c0_i32, %c0_i32_0 : i32, i32
  }
  func.func @transform_10(%arg0: i32) -> (i32, i32) {
    %c0_i32 = arith.constant 0 : i32
    %c0_i32_0 = arith.constant 0 : i32
    %c0_i32_1 = arith.constant 0 : i32
    return %c0_i32, %c0_i32_0 : i32, i32
  }
  func.func @transform_11(%arg0: i32) -> (i32, i32, i32) {
    %c0_i32 = arith.constant 0 : i32
    %c0_i32_0 = arith.constant 0 : i32
    %c0_i32_1 = arith.constant 0 : i32
    %c0_i32_2 = arith.constant 0 : i32
    return %c0_i32, %c0_i32_0, %c0_i32_1 : i32, i32, i32
  }
  func.func @transform_12(%arg0: i32) -> (i32, i32) {
    %c0_i32 = arith.constant 0 : i32
    %c0_i32_0 = arith.constant 0 : i32
    return %arg0, %c0_i32 : i32, i32
  }
}

</mosaic_0001>

<bundles_post_ra>
// kernel: resnet_forward.1
= control target key start
LH: loop header
LB: loop body
LE: loop exit
PB: predicated region body
PF: predicated region fallthrough
CT: control target
= control target key end

     0   :  { %17 = vsyncpa [#allocation3], 0  ;;  %s2188_s0 = inlined_call_operand.vmem [shape: f32[24,128], index: 0, kind: input, shape index: {}]   ;;  %s2189_s1 = inlined_call_operand.hbm [shape: bf16[128,128], index: 1, kind: input, shape index: {}]   ;;  %s2190_s2 = inlined_call_operand.hbm [shape: bf16[128,128], index: 2, kind: input, shape index: {}]   ;;  %s2191_s3 = inlined_call_operand.hbm [shape: bf16[128,128], index: 3, kind: input, shape index: {}]   ;;  %s2192_s4 = inlined_call_operand.hbm [shape: bf16[128,128], index: 4, kind: input, shape index: {}]   ;;  %s2193_s5 = inlined_call_operand.hbm [shape: bf16[128,128], index: 5, kind: input, shape index: {}]   ;;  %s2194_s6 = inlined_call_operand.hbm [shape: bf16[128,128], index: 6, kind: input, shape index: {}]   ;;  %s2195_s7 = inlined_call_operand.hbm [shape: bf16[128,128], index: 7, kind: input, shape index: {}]   ;;  %s2196_s8 = inlined_call_operand.hbm [shape: bf16[128,128], index: 8, kind: input, shape index: {}]   ;;  %s2197_s9 = inlined_call_operand.hbm [shape: bf16[128,128], index: 9, kind: input, shape index: {}]   ;;  %s2198_s10 = inlined_call_operand.vmem [shape: f32[10,128], index: 10, kind: input, shape index: {}]   ;;  %s2199_s11 = inlined_call_operand.hbm [shape: bf16[3,128,128], index: 11, kind: input, shape index: {}]   ;;  %s2200_s12 = inlined_call_operand.vmem [shape: f32[8,128], index: 12, kind: output, shape index: {}]  }
   0x1   :  { %18 = vsyncpa [#allocation5], 0 }
   0x2   :  { %19 = vsyncpa [#allocation8], 0 }
   0x3   :  { %20 = vsyncpa [#allocation11], 0 }
   0x4   :  { %21 = vsyncpa [#allocation14], 0 }
   0x5   :  { %22 = vsyncpa [#allocation17], 0  ;;  %s42_s23 = sshll.u32 %s2190_s2, 4  ;;  %s2000_s24 = smov [#allocation4]   ;;  %s43_s23 = int_to_ptr.hbm [resolvable:$true] %s42_s23 }
   0x6   :  { %s44_s25 = sshll.u32 %s2000_s24, 4  ;;  %s68_s28 = sshll.u32 %s2192_s4, 4  ;;  %s45_s25 = int_to_ptr.vmem [resolvable:$true] %s44_s25  ;;  %s69_s28 = int_to_ptr.hbm [resolvable:$true] %s68_s28 }
   0x7   :  { %s2001_s29 = smov 64   ;;  %s2002_s30 = smov 4  }
   0x8   :  { %50 = dma.hbm_to_vmem [thread:$0]  %s43_s23, 1024, %s45_s25, [#allocation5], %s2001_s29, %s2001_s29, %s2002_s30  }
   0x9   :  { %s2003_s13 = smov [#allocation7]   ;;  %s94_s2 = sshll.u32 %s2194_s6, 4  ;;  %s95_s2 = int_to_ptr.hbm [resolvable:$true] %s94_s2 }
   0xa   :  { %s70_s14 = sshll.u32 %s2003_s13, 4  ;;  %s120_s18 = sshll.u32 %s2196_s8, 4  ;;  %s71_s14 = int_to_ptr.vmem [resolvable:$true] %s70_s14  ;;  %s121_s18 = int_to_ptr.hbm [resolvable:$true] %s120_s18 }
   0xb   :  { %76 = dma.hbm_to_vmem [thread:$0]  %s69_s28, 1024, %s71_s14, [#allocation8], %s2001_s29, %s2001_s29, %s2002_s30  }
   0xc   :  { %s2004_s19 = smov [#allocation10]   ;;  %s2005_s21 = smov [#allocation13]  }
   0xd   :  { %s96_s20 = sshll.u32 %s2004_s19, 4  ;;  %s122_s6 = sshll.u32 %s2005_s21, 4  ;;  %s97_s20 = int_to_ptr.vmem [resolvable:$true] %s96_s20  ;;  %s123_s6 = int_to_ptr.vmem [resolvable:$true] %s122_s6 }
   0xe   :  { %102 = dma.hbm_to_vmem [thread:$0]  %s95_s2, 1024, %s97_s20, [#allocation11], %s2001_s29, %s2001_s29, %s2002_s30  }
   0xf   :  { %s29_s24 = sshll.u32 %s2189_s1, 4  ;;  %s55_s26 = sshll.u32 %s2191_s3, 4  ;;  %s30_s24 = int_to_ptr.hbm [resolvable:$true] %s29_s24  ;;  %s56_s26 = int_to_ptr.hbm [resolvable:$true] %s55_s26 }
  0x10   :  { %128 = dma.hbm_to_vmem [thread:$0]  %s121_s18, 1024, %s123_s6, [#allocation14], %s2001_s29, %s2001_s29, %s2002_s30  }
  0x11   :  { %s2006_s27 = smov [#allocation2]   ;;  %s2007_s13 = smov [#allocation6]  }
  0x12   :  { %s31_s28 = sshll.u32 %s2006_s27, 4  ;;  %s57_s1 = sshll.u32 %s2007_s13, 4  ;;  %s32_s28 = int_to_ptr.vmem [resolvable:$true] %s31_s28  ;;  %s58_s1 = int_to_ptr.vmem [resolvable:$true] %s57_s1 }
  0x13   :  { %37 = dma.hbm_to_vmem [thread:$0]  %s30_s24, 1024, %s32_s28, [#allocation3], %s2001_s29, %s2001_s29, %s2002_s30  }
  0x14   :  { %s81_s16 = sshll.u32 %s2193_s5, 4  ;;  %s107_s4 = sshll.u32 %s2195_s7, 4  ;;  %s82_s16 = int_to_ptr.hbm [resolvable:$true] %s81_s16  ;;  %s108_s4 = int_to_ptr.hbm [resolvable:$true] %s107_s4 }
  0x15   :  { %63 = dma.hbm_to_vmem [thread:$0]  %s56_s26, 1024, %s58_s1, [#allocation5], %s2001_s29, %s2001_s29, %s2002_s30  }
  0x16   :  { %s2008_s17 = smov [#allocation9]   ;;  %s2009_s19 = smov [#allocation12]  }
  0x17   :  { %s83_s18 = sshll.u32 %s2008_s17, 4  ;;  %s109_s5 = sshll.u32 %s2009_s19, 4  ;;  %s84_s18 = int_to_ptr.vmem [resolvable:$true] %s83_s18  ;;  %s110_s5 = int_to_ptr.vmem [resolvable:$true] %s109_s5 }
  0x18   :  { %89 = dma.hbm_to_vmem [thread:$0]  %s82_s16, 1024, %s84_s18, [#allocation8], %s2001_s29, %s2001_s29, %s2002_s30  }
  0x19   :  { %s133_s6 = sshll.u32 %s2197_s9, 4  ;;  %s148_s23 = sshll.u32 %s2199_s11, 4  ;;  %s134_s6 = int_to_ptr.hbm [resolvable:$true] %s133_s6  ;;  %s149_s23 = int_to_ptr.hbm [resolvable:$true] %s148_s23 }
  0x1a   :  { %115 = dma.hbm_to_vmem [thread:$0]  %s108_s4, 1024, %s110_s5, [#allocation11], %s2001_s29, %s2001_s29, %s2002_s30  }
  0x1b   :  { %s2010_s24 = smov [#allocation15]   ;;  %s2011_s25 = smov [#allocation16]  }
  0x1c   :  { %s135_s8 = sshll.u32 %s2010_s24, 4  ;;  %s150_s9 = sshll.u32 %s2011_s25, 4  ;;  %s136_s8 = int_to_ptr.vmem [resolvable:$true] %s135_s8  ;;  %s151_s9 = int_to_ptr.vmem [resolvable:$true] %s150_s9 }
  0x1d   :  { %141 = dma.hbm_to_vmem [thread:$0]  %s134_s6, 1024, %s136_s8, [#allocation14], %s2001_s29, %s2001_s29, %s2002_s30  }
  0x1e   :  { %156 = dma.hbm_to_vmem [thread:$0]  %s149_s23, 3072, %s151_s9, [#allocation17], %s2001_s29, %s2001_s29, %s2002_s30  }
  0x1f   :  { %1988 = dma.done.wait [#allocation3], 1024  }
  0x20   :  { %1989 = vsyncadd [#allocation3], 4294966272 }
  0x21   :  { %1990 = dma.done.wait [#allocation5], 2048  }
  0x22   :  { %1991 = vsyncadd [#allocation5], 4294965248 }
  0x23   :  { %1992 = dma.done.wait [#allocation8], 2048  }
  0x24   :  { %1993 = vsyncadd [#allocation8], 4294965248 }
  0x25   :  { %1994 = dma.done.wait [#allocation11], 2048  }
  0x26   :  { %1995 = vsyncadd [#allocation11], 4294965248 }
  0x27   :  { %1996 = dma.done.wait [#allocation14], 2048  }
  0x28   :  { %1997 = vsyncadd [#allocation14], 4294965248 }
  0x29   :  { %1998 = dma.done.wait [#allocation17], 3072  }
  0x2a   :  { %1999 = vsyncadd [#allocation17], 4294964224  ;;  %v1637_v0 = vld [vmem:[#allocation2 + $0x38] sm:$0xff]  ;;  %v1636_v1 = vld [vmem:[#allocation2 + $0x30] sm:$0xff] }
  0x2b   :  { %268 = vmatpush.bf16.msra.mxu0 %v1637_v0  ;;  %v1635_v2 = vld [vmem:[#allocation2 + $0x28] sm:$0xff]  ;;  %v1634_v3 = vld [vmem:[#allocation2 + $0x20] sm:$0xff]  ;;  %v1633_v4 = vld [vmem:[#allocation2 + $0x18] sm:$0xff] }
  0x2c   :  { %v1653_v5 = vld [vmem:[#allocation6 + $0x38] sm:$0xff]  ;;  %v1632_v6 = vld [vmem:[#allocation2 + $0x10] sm:$0xff]  ;;  %v1631_v10 = vld [vmem:[#allocation2 + $0x8] sm:$0xff] }
  0x2d   :  { %v1645_v7 = vld [vmem:[#allocation4 + $0x38] sm:$0xff]  ;;  %444 = vmatpush.bf16.msra.mxu2 %v1653_v5  ;;  %v1652_v8 = vld [vmem:[#allocation6 + $0x30] sm:$0xff]  ;;  %v1651_v11 = vld [vmem:[#allocation6 + $0x28] sm:$0xff] }
  0x2e   :  { %357 = vmatpush.bf16.msra.mxu1 %v1645_v7  ;;  %v1644_v9 = vld [vmem:[#allocation4 + $0x30] sm:$0xff]  ;;  %v1643_v12 = vld [vmem:[#allocation4 + $0x28] sm:$0xff]  ;;  %v1630_v13 = vld [vmem:[#allocation2] sm:$0xff] }
  0x2f   :  { %269 = vmatpush.bf16.msra.mxu0 %v1636_v1  ;;  %v197_v14 = vld [vmem:[%s2188_s0] sm:$0xff]  ;;  %v198_v15 = vld [vmem:[%s2188_s0 + $0x8] sm:$0xff]  ;;  %v1649_v19 = vld [vmem:[#allocation6 + $0x18] sm:$0xff] }
  0x30   :  { %v1650_v16 = vld [vmem:[#allocation6 + $0x20] sm:$0xff]  ;;  %v200_v18 = vpack.c.bf16 %v198_v15, %v197_v14  ;;  %v1648_v20 = vld [vmem:[#allocation6 + $0x10] sm:$0xff]  ;;  %v1647_v21 = vld [vmem:[#allocation6 + $0x8] sm:$0xff] }
  0x31   :  { %445 = vmatpush.bf16.msra.mxu2 %v1652_v8  ;;  %v1642_v17 = vld [vmem:[#allocation4 + $0x20] sm:$0xff]  ;;  %v199_v22 = vld [vmem:[%s2188_s0 + $0x10] sm:$0xff]  ;;  %v1641_v24 = vld [vmem:[#allocation4 + $0x18] sm:$0xff] }
  0x32   :  { %358 = vmatpush.bf16.msra.mxu1 %v1644_v9  ;;  %v201_v23 = vpack.c.bf16 %v199_v22, %v199_v22  ;;  %v1646_v25 = vld [vmem:[#allocation6] sm:$0xff]  ;;  %v1640_v26 = vld [vmem:[#allocation4 + $0x10] sm:$0xff]  ;;  %v1639_v27 = vld [vmem:[#allocation4 + $0x8] sm:$0xff] }
  0x33   :  { %270 = vmatpush.bf16.msra.mxu0 %v1635_v2  ;;  %v1638_v28 = vld [vmem:[#allocation4] sm:$0xff]  ;;  %v1661_v29 = vld [vmem:[#allocation7 + $0x38] sm:$0xff]  ;;  %v1660_v32 = vld [vmem:[#allocation7 + $0x30] sm:$0xff] }
  0x34   :  { %v1677_v30 = vld [vmem:[#allocation10 + $0x38] sm:$0xff]  ;;  %533 = vmatpush.bf16.msra.mxu3 %v1661_v29  ;;  %v1676_v33 = vld [vmem:[#allocation10 + $0x30] sm:$0xff]  ;;  %v1738_v34 = vld [vmem:[%s2198_s10] ss:$0 sm:$0xff] }
  0x35   :  { %446 = vmatpush.bf16.msra.mxu2 %v1651_v11  ;;  %v1659_v46 = vld [vmem:[#allocation7 + $0x28] sm:$0xff]  ;;  %v1658_v48 = vld [vmem:[#allocation7 + $0x20] sm:$0xff]  ;;  %v1657_v50 = vld [vmem:[#allocation7 + $0x18] sm:$0xff] }
  0x36   :  { %359 = vmatpush.bf16.msra.mxu1 %v1643_v12  ;;  %v1675_v47 = vld [vmem:[#allocation10 + $0x28] sm:$0xff]  ;;  %v1674_v49 = vld [vmem:[#allocation10 + $0x20] sm:$0xff]  ;;  %v1673_v51 = vld [vmem:[#allocation10 + $0x18] sm:$0xff] }
  0x37   :  { %271 = vmatpush.bf16.msra.mxu0 %v1634_v3  ;;  %v1656_v53 = vld [vmem:[#allocation7 + $0x10] sm:$0xff]  ;;  %v1655_v55 = vld [vmem:[#allocation7 + $0x8] sm:$0xff]  ;;  %v1654_v58 = vld [vmem:[#allocation7] sm:$0xff] }
  0x38   :  { %534 = vmatpush.bf16.msra.mxu3 %v1660_v32  ;;  %v1672_v54 = vld [vmem:[#allocation10 + $0x10] sm:$0xff]  ;;  %v1671_v56 = vld [vmem:[#allocation10 + $0x8] sm:$0xff]  ;;  %v1670_v59 = vld [vmem:[#allocation10] sm:$0xff] }
  0x39   :  { %447 = vmatpush.bf16.msra.mxu2 %v1650_v16  ;;  %v1740_v63 = vld [vmem:[%s2198_s10 + $0x1] ss:$0 sm:$0xff]  ;;  %v1669_v0 = vld [vmem:[#allocation9 + $0x38] sm:$0xff]  ;;  %v1668_v1 = vld [vmem:[#allocation9 + $0x30] sm:$0xff] }
  0x3a   :  { %360 = vmatpush.bf16.msra.mxu1 %v1642_v17  ;;  %v1739_v2 = vld [vmem:[%s2198_s10 + $0x2] ss:$0 sm:$0xff]  ;;  %v1665_v22 = vld [vmem:[#allocation9 + $0x18] sm:$0xff] }
  0x3b   :  { %272 = vmatpush.bf16.msra.mxu0 %v1633_v4  ;;  %v1667_v4 = vld [vmem:[#allocation9 + $0x28] sm:$0xff] }
  0x3c   :  { %535 = vmatpush.bf16.msra.mxu3 %v1659_v46 }
  0x3d   :  { %448 = vmatpush.bf16.msra.mxu2 %v1649_v19 }
  0x3e   :  { %361 = vmatpush.bf16.msra.mxu1 %v1641_v24  ;;  %v1663_v24 = vld [vmem:[#allocation9 + $0x8] sm:$0xff] }
  0x3f   :  { %273 = vmatpush.bf16.msra.mxu0 %v1632_v6 }
  0x40   :  { %536 = vmatpush.bf16.msra.mxu3 %v1658_v48 }
  0x41   :  { %449 = vmatpush.bf16.msra.mxu2 %v1648_v20 }
  0x42   :  { %362 = vmatpush.bf16.msra.mxu1 %v1640_v26 }
  0x43   :  { %274 = vmatpush.bf16.msra.mxu0 %v1631_v10 }
  0x44   :  { %537 = vmatpush.bf16.msra.mxu3 %v1657_v50 }
  0x45   :  { %450 = vmatpush.bf16.msra.mxu2 %v1647_v21  ;;  %v1666_v21 = vld [vmem:[#allocation9 + $0x20] sm:$0xff] }
  0x46   :  { %363 = vmatpush.bf16.msra.mxu1 %v1639_v27  ;;  %v1685_v27 = vld [vmem:[#allocation12 + $0x38] sm:$0xff] }
  0x47   :  { %275 = vmatpush.bf16.msra.mxu0 %v1630_v13 }
  0x48   :  { %538 = vmatpush.bf16.msra.mxu3 %v1656_v53  ;;  %v1680_v53 = vld [vmem:[#allocation12 + $0x10] sm:$0xff] }
  0x49   :  { %451 = vmatpush.bf16.msra.mxu2 %v1646_v25  ;;  %v1662_v25 = vld [vmem:[#allocation9] sm:$0xff] }
  0x4a   :  { %276 = vmatmul.bf16.vlgmr.msra.gmra.mxu0 %v200_v18  ;;  %364 = vmatpush.bf16.msra.mxu1 %v1638_v28  ;;  %v1701_v28 = vld [vmem:[#allocation15 + $0x38] sm:$0xff] }
  0x4b   :  { %622 = vmatpush.bf16.msrb.mxu0 %v1669_v0  ;;  %v1741_v0 = vld [vmem:[%s2198_s10 + $0x5] ss:$0 sm:$0xff] }
  0x4c   :  { %452 = vmatmul.bf16.vlgmr.msra.gmra.mxu2 %v200_v18  ;;  %539 = vmatpush.bf16.msra.mxu3 %v1655_v55  ;;  %v1679_v55 = vld [vmem:[#allocation12 + $0x8] sm:$0xff] }
  0x4d   :  { %798 = vmatpush.bf16.msrb.mxu2 %v1685_v27  ;;  %v1708_v27 = vld [vmem:[#allocation16 + $0x30] sm:$0xff] }
  0x4e   :  { %709 = vmatpush.bf16.msrb.mxu1 %v1677_v30  ;;  %v1684_v30 = vld [vmem:[#allocation12 + $0x30] sm:$0xff] }
  0x4f   :  { %623 = vmatpush.bf16.msrb.mxu0 %v1668_v1  ;;  %v1691_v1 = vld [vmem:[#allocation13 + $0x28] sm:$0xff] }
  0x50   :  { %540 = vmatpush.bf16.msra.mxu3 %v1654_v58  ;;  %v1694_v58 = vld [vmem:[#allocation15] sm:$0xff] }
  0x51   :  { %799 = vmatpush.bf16.msrb.mxu2 %v1684_v30 }
  0x52   :  { %710 = vmatpush.bf16.msrb.mxu1 %v1676_v33  ;;  %v1742_v33 = vld [vmem:[%s2198_s10 + $0x3] ss:$0 sm:$0xff] }
  0x53   :  { %624 = vmatpush.bf16.msrb.mxu0 %v1667_v4 }
  0x56   :  { %711 = vmatpush.bf16.msrb.mxu1 %v1675_v47 }
  0x57   :  { %625 = vmatpush.bf16.msrb.mxu0 %v1666_v21  ;;  %v1687_v21 = vld [vmem:[#allocation13 + $0x8] sm:$0xff] }
  0x5a   :  { %281 = vmatmul.bf16.gmra.mxu0 %v201_v23  ;;  %712 = vmatpush.bf16.msrb.mxu1 %v1674_v49 }
  0x5b   :  { %626 = vmatpush.bf16.msrb.mxu0 %v1665_v22  ;;  %v1686_v22 = vld [vmem:[#allocation13] sm:$0xff] }
  0x5c   :  { %457 = vmatmul.bf16.gmra.mxu2 %v201_v23  ;;  %v1664_v23 = vld [vmem:[#allocation9 + $0x10] sm:$0xff] }
  0x5e   :  { %713 = vmatpush.bf16.msrb.mxu1 %v1673_v51  ;;  %v1681_v51 = vld [vmem:[#allocation12 + $0x18] sm:$0xff] }
  0x5f   :  { %627 = vmatpush.bf16.msrb.mxu0 %v1664_v23 }
  0x62   :  { %714 = vmatpush.bf16.msrb.mxu1 %v1672_v54  ;;  %v1696_v54 = vld [vmem:[#allocation15 + $0x10] sm:$0xff] }
  0x63   :  { %628 = vmatpush.bf16.msrb.mxu0 %v1663_v24  ;;  %v1709_v24 = vld [vmem:[#allocation16 + $0x38] sm:$0xff] }
  0x66   :  { %715 = vmatpush.bf16.msrb.mxu1 %v1671_v56  ;;  %v1695_v56 = vld [vmem:[#allocation15 + $0x8] sm:$0xff] }
  0x67   :  { %629 = vmatpush.bf16.msrb.mxu0 %v1662_v25  ;;  %v1717_v25 = vld [vmem:[#allocation16 + $0x78] sm:$0xff] }
  0x6a   :  { %716 = vmatpush.bf16.msrb.mxu1 %v1670_v59 }
  0x6b   :  { %974 = vmatpush.bf16.msra.mxu0 %v1701_v28  ;;  %v1716_v28 = vld [vmem:[#allocation16 + $0x70] sm:$0xff] }
  0xc7   :  { %v277_v31 = vpop.f32.mrf.mxu0 }
  0xc8   :  { %v278_v35 = vadd.f32 %v1738_v34, %v277_v31  ;;  %v1700_v31 = vld [vmem:[#allocation15 + $0x30] sm:$0xff] }
  0xc9   :  { %975 = vmatpush.bf16.msra.mxu0 %v1700_v31  ;;  %v1745_v31 = vld [vmem:[%s2198_s10 + $0x6] ss:$0 sm:$0xff] }
  0xca   :  { %v286_v38 = vmax.f32 %v278_v35, 0.0  ;;  %v1699_v35 = vld [vmem:[#allocation15 + $0x28] sm:$0xff] }
  0xcd   :  { %976 = vmatpush.bf16.msra.mxu0 %v1699_v35 }
  0xcf   :  { %v279_v36 = vpop.f32.mrf.mxu0  ;;  %v453_v52 = vpop.f32.mrf.mxu2 }
  0xd0   :  { %v280_v37 = vadd.f32 %v1738_v34, %v279_v36  ;;  %v454_v6 = vadd.f32 %v1739_v2, %v453_v52  ;;  %v1697_v52 = vld [vmem:[#allocation15 + $0x18] sm:$0xff] }
  0xd2   :  { %v287_v39 = vmax.f32 %v280_v37, 0.0 }
  0xd4   :  { %v289_v40 = vpack.c.bf16 %v287_v39, %v286_v38  ;;  %v1682_v39 = vld [vmem:[#allocation12 + $0x20] sm:$0xff] }
  0xd6   :  { %365 = vmatmul.bf16.vlgmr.msra.gmra.mxu1 %v289_v40  ;;  %v1698_v40 = vld [vmem:[#allocation15 + $0x20] sm:$0xff] }
  0xd7   :  { %v282_v41 = vpop.f32.mrf.mxu0  ;;  %v455_v57 = vpop.f32.mrf.mxu2  ;;  %977 = vmatpush.bf16.msra.mxu0 %v1698_v40  ;;  %1078 = vmatpush.bf16.msra.mxu1 %v1717_v25 }
  0xd8   :  { %v283_v42 = vadd.f32 %v1738_v34, %v282_v41  ;;  %v456_v9 = vadd.f32 %v1739_v2, %v455_v57  ;;  %v1683_v34 = vld [vmem:[#allocation12 + $0x28] sm:$0xff]  ;;  %v1678_v57 = vld [vmem:[#allocation12] sm:$0xff] }
  0xd9   :  { %800 = vmatpush.bf16.msrb.mxu2 %v1683_v34  ;;  %v1715_v34 = vld [vmem:[#allocation16 + $0x68] sm:$0xff] }
  0xda   :  { %v288_v43 = vmax.f32 %v283_v42, 0.0 }
  0xdb   :  { %978 = vmatpush.bf16.msra.mxu0 %v1697_v52  ;;  %1079 = vmatpush.bf16.msra.mxu1 %v1716_v28  ;;  %v1723_v52 = vld [vmem:[#allocation16 + $0xa8] sm:$0xff] }
  0xdc   :  { %v290_v45 = vpack.c.bf16 %v288_v43, %v288_v43 }
  0xdd   :  { %801 = vmatpush.bf16.msrb.mxu2 %v1682_v39  ;;  %v1714_v39 = vld [vmem:[#allocation16 + $0x60] sm:$0xff] }
  0xdf   :  { %v284_v44 = vpop.f32.mrf.mxu0  ;;  %v458_v60 = vpop.f32.mrf.mxu2  ;;  %979 = vmatpush.bf16.msra.mxu0 %v1696_v54  ;;  %1080 = vmatpush.bf16.msra.mxu1 %v1715_v34  ;;  %v1703_v54 = vld [vmem:[#allocation16 + $0x8] sm:$0xff] }
  0xe0   :  { %v459_v17 = vadd.f32 %v1739_v2, %v458_v60  ;;  %v1743_v60 = vld [vmem:[%s2198_s10 + $0x4] ss:$0 sm:$0xff] }
  0xe1   :  { %802 = vmatpush.bf16.msrb.mxu2 %v1681_v51 }
  0xe3   :  { %980 = vmatpush.bf16.msra.mxu0 %v1695_v56  ;;  %1081 = vmatpush.bf16.msra.mxu1 %v1714_v39  ;;  %v1712_v56 = vld [vmem:[#allocation16 + $0x50] sm:$0xff] }
  0xe5   :  { %803 = vmatpush.bf16.msrb.mxu2 %v1680_v53  ;;  %v1713_v53 = vld [vmem:[#allocation16 + $0x58] sm:$0xff] }
  0xe6   :  { %370 = vmatmul.bf16.gmra.mxu1 %v290_v45 }
  0xe7   :  { %v460_v61 = vpop.f32.mrf.mxu2  ;;  %981 = vmatpush.bf16.msra.mxu0 %v1694_v58  ;;  %1082 = vmatpush.bf16.msra.mxu1 %v1713_v53  ;;  %v1721_v58 = vld [vmem:[#allocation16 + $0x98] sm:$0xff] }
  0xe8   :  { %v1693_v61 = vld [vmem:[#allocation13 + $0x38] sm:$0xff] }
  0xe9   :  { %804 = vmatpush.bf16.msrb.mxu2 %v1679_v55  ;;  %887 = vmatpush.bf16.msrb.mxu3 %v1693_v61  ;;  %v1722_v55 = vld [vmem:[#allocation16 + $0xa0] sm:$0xff] }
  0xea   :  { %v1710_v61 = vld [vmem:[#allocation16 + $0x40] sm:$0xff] }
  0xeb   :  { %1083 = vmatpush.bf16.msra.mxu1 %v1712_v56 }
  0xed   :  { %805 = vmatpush.bf16.msrb.mxu2 %v1678_v57  ;;  %v1702_v57 = vld [vmem:[#allocation16] sm:$0xff] }
  0xf1   :  { %1139 = vmatpush.bf16.msra.mxu2 %v1709_v24 }
  0xf5   :  { %1140 = vmatpush.bf16.msra.mxu2 %v1708_v27 }
 0x153   :  { %v366_v62 = vpop.f32.mrf.mxu1 }
 0x154   :  { %v367_v3 = vadd.f32 %v1740_v63, %v366_v62  ;;  %v1692_v62 = vld [vmem:[#allocation13 + $0x30] sm:$0xff] }
 0x155   :  { %888 = vmatpush.bf16.msrb.mxu3 %v1692_v62  ;;  %v1719_v62 = vld [vmem:[#allocation16 + $0x88] sm:$0xff] }
 0x156   :  { %v375_v7 = vmax.f32 %v367_v3, 0.0 }
 0x158   :  { %v462_v11 = vadd.f32 %v454_v6, %v375_v7 }
 0x159   :  { %889 = vmatpush.bf16.msrb.mxu3 %v1691_v1  ;;  %v1744_v1 = vld [vmem:[%s2198_s10 + $0x8] ss:$0 sm:$0xff] }
 0x15b   :  { %v368_v5 = vpop.f32.mrf.mxu1 }
 0x15c   :  { %v369_v8 = vadd.f32 %v1740_v63, %v368_v5 }
 0x15e   :  { %v376_v10 = vmax.f32 %v369_v8, 0.0 }
 0x160   :  { %v463_v12 = vadd.f32 %v456_v9, %v376_v10 }
 0x162   :  { %v465_v13 = vpack.c.bf16 %v463_v12, %v462_v11 }
 0x163   :  { %v371_v14 = vpop.f32.mrf.mxu1 }
 0x164   :  { %541 = vmatmul.bf16.vlgmr.msra.gmra.mxu3 %v465_v13  ;;  %717 = vmatmul.bf16.vlgmr.msrb.gmra.mxu1 %v465_v13  ;;  %v372_v15 = vadd.f32 %v1740_v63, %v371_v14 }
 0x166   :  { %v377_v16 = vmax.f32 %v372_v15, 0.0 }
 0x168   :  { %v464_v19 = vadd.f32 %v459_v17, %v377_v16 }
 0x16a   :  { %v466_v20 = vpack.c.bf16 %v464_v19, %v464_v19  ;;  %v1689_v19 = vld [vmem:[#allocation13 + $0x18] sm:$0xff] }
 0x16b   :  { %v373_v18 = vpop.f32.mrf.mxu1 }
 0x16c   :  { %v1690_v18 = vld [vmem:[#allocation13 + $0x20] sm:$0xff] }
 0x16d   :  { %890 = vmatpush.bf16.msrb.mxu3 %v1690_v18 }
 0x171   :  { %891 = vmatpush.bf16.msrb.mxu3 %v1689_v19 }
 0x174   :  { %546 = vmatmul.bf16.gmra.mxu3 %v466_v20  ;;  %722 = vmatmul.bf16.gmra.mxu1 %v466_v20  ;;  %v1688_v20 = vld [vmem:[#allocation13 + $0x10] sm:$0xff] }
 0x175   :  { %892 = vmatpush.bf16.msrb.mxu3 %v1688_v20 }
 0x179   :  { %893 = vmatpush.bf16.msrb.mxu3 %v1687_v21 }
 0x17d   :  { %894 = vmatpush.bf16.msrb.mxu3 %v1686_v22 }
 0x1e1   :  { %v2155_v26 = vpop.f32.mrf.mxu1 }
 0x1e2   :  { %v719_v5 = vadd.f32 %v1741_v0, %v2155_v26 }
 0x1e7   :  { %v542_v29 = vpop.f32.mrf.mxu3 }
 0x1e8   :  { %v543_v36 = vadd.f32 %v1742_v33, %v542_v29  ;;  %v1725_v29 = vld [vmem:[#allocation16 + $0xb8] sm:$0xff] }
 0x1e9   :  { %v720_v32 = vpop.f32.mrf.mxu1  ;;  %1218 = vmatpush.bf16.msra.mxu3 %v1725_v29 }
 0x1ea   :  { %v551_v42 = vmax.f32 %v543_v36, 0.0  ;;  %v721_v6 = vadd.f32 %v1741_v0, %v720_v32  ;;  %v1724_v32 = vld [vmem:[#allocation16 + $0xb0] sm:$0xff] }
 0x1ed   :  { %1219 = vmatpush.bf16.msra.mxu3 %v1724_v32 }
 0x1ef   :  { %v544_v37 = vpop.f32.mrf.mxu3 }
 0x1f0   :  { %v545_v38 = vadd.f32 %v1742_v33, %v544_v37 }
 0x1f1   :  { %v723_v41 = vpop.f32.mrf.mxu1  ;;  %1220 = vmatpush.bf16.msra.mxu3 %v1723_v52 }
 0x1f2   :  { %v552_v43 = vmax.f32 %v545_v38, 0.0  ;;  %v724_v15 = vadd.f32 %v1741_v0, %v723_v41  ;;  %v1706_v38 = vld [vmem:[#allocation16 + $0x20] sm:$0xff] }
 0x1f3   :  { %v1746_v0 = vld [vmem:[%s2198_s10 + $0x7] ss:$0 sm:$0xff] }
 0x1f4   :  { %v554_v44 = vpack.c.bf16 %v552_v43, %v551_v42 }
 0x1f5   :  { %1221 = vmatpush.bf16.msra.mxu3 %v1722_v55 }
 0x1f6   :  { %630 = vmatmul.bf16.vlgmr.msrb.gmra.mxu0 %v554_v44  ;;  %v1705_v44 = vld [vmem:[#allocation16 + $0x18] sm:$0xff] }
 0x1f7   :  { %v547_v45 = vpop.f32.mrf.mxu3 }
 0x1f8   :  { %v548_v47 = vadd.f32 %v1742_v33, %v547_v45  ;;  %v1707_v33 = vld [vmem:[#allocation16 + $0x28] sm:$0xff] }
 0x1f9   :  { %v725_v46 = vpop.f32.mrf.mxu1  ;;  %1141 = vmatpush.bf16.msra.mxu2 %v1707_v33  ;;  %1222 = vmatpush.bf16.msra.mxu3 %v1721_v58 }
 0x1fa   :  { %v553_v48 = vmax.f32 %v548_v47, 0.0  ;;  %v1704_v46 = vld [vmem:[#allocation16 + $0x10] sm:$0xff] }
 0x1fc   :  { %v555_v50 = vpack.c.bf16 %v553_v48, %v553_v48 }
 0x1fd   :  { %1142 = vmatpush.bf16.msra.mxu2 %v1706_v38 }
 0x1ff   :  { %v549_v49 = vpop.f32.mrf.mxu3 }
 0x201   :  { %1143 = vmatpush.bf16.msra.mxu2 %v1705_v44 }
 0x205   :  { %1144 = vmatpush.bf16.msra.mxu2 %v1704_v46 }
 0x206   :  { %635 = vmatmul.bf16.gmra.mxu0 %v555_v50 }
 0x209   :  { %1145 = vmatpush.bf16.msra.mxu2 %v1703_v54 }
 0x20d   :  { %1146 = vmatpush.bf16.msra.mxu2 %v1702_v57 }
 0x273   :  { %v631_v59 = vpop.f32.mrf.mxu0 }
 0x274   :  { %v632_v63 = vadd.f32 %v1743_v60, %v631_v59  ;;  %v1711_v59 = vld [vmem:[#allocation16 + $0x48] sm:$0xff] }
 0x275   :  { %1084 = vmatpush.bf16.msra.mxu1 %v1711_v59 }
 0x276   :  { %v640_v3 = vmax.f32 %v632_v63, 0.0  ;;  %v1718_v63 = vld [vmem:[#allocation16 + $0x80] sm:$0xff] }
 0x278   :  { %v727_v8 = vadd.f32 %v719_v5, %v640_v3 }
 0x279   :  { %1085 = vmatpush.bf16.msra.mxu1 %v1710_v61 }
 0x27b   :  { %v633_v2 = vpop.f32.mrf.mxu0 }
 0x27c   :  { %v634_v4 = vadd.f32 %v1743_v60, %v633_v2 }
 0x27e   :  { %v641_v7 = vmax.f32 %v634_v4, 0.0 }
 0x280   :  { %v728_v9 = vadd.f32 %v721_v6, %v641_v7 }
 0x282   :  { %v730_v10 = vpack.c.bf16 %v728_v9, %v727_v8 }
 0x283   :  { %v636_v11 = vpop.f32.mrf.mxu0 }
 0x284   :  { %806 = vmatmul.bf16.vlgmr.msrb.gmra.mxu2 %v730_v10  ;;  %982 = vmatmul.bf16.vlgmr.msra.gmra.mxu0 %v730_v10  ;;  %v637_v12 = vadd.f32 %v1743_v60, %v636_v11  ;;  %v1720_v60 = vld [vmem:[#allocation16 + $0x90] sm:$0xff] }
 0x285   :  { %1223 = vmatpush.bf16.msra.mxu3 %v1720_v60 }
 0x286   :  { %v642_v13 = vmax.f32 %v637_v12, 0.0 }
 0x288   :  { %v729_v16 = vadd.f32 %v724_v15, %v642_v13 }
 0x289   :  { %1224 = vmatpush.bf16.msra.mxu3 %v1719_v62 }
 0x28a   :  { %v731_v17 = vpack.c.bf16 %v729_v16, %v729_v16 }
 0x28b   :  { %v638_v14 = vpop.f32.mrf.mxu0 }
 0x28d   :  { %1225 = vmatpush.bf16.msra.mxu3 %v1718_v63 }
 0x294   :  { %811 = vmatmul.bf16.gmra.mxu2 %v731_v17  ;;  %987 = vmatmul.bf16.gmra.mxu0 %v731_v17 }
 0x301   :  { %v2167_v23 = vpop.f32.mrf.mxu0 }
 0x302   :  { %v984_v4 = vadd.f32 %v1744_v1, %v2167_v23 }
 0x307   :  { %v807_v26 = vpop.f32.mrf.mxu2 }
 0x308   :  { %v808_v35 = vadd.f32 %v1745_v31, %v807_v26  ;;  %v1747_v26 = vld [vmem:[%s2198_s10 + $0x9] ss:$0 sm:$0xff] }
 0x309   :  { %v2169_v30 = vpop.f32.mrf.mxu0 }
 0x30a   :  { %v816_v41 = vmax.f32 %v808_v35, 0.0  ;;  %v986_v10 = vadd.f32 %v1744_v1, %v2169_v30 }
 0x30f   :  { %v809_v36 = vpop.f32.mrf.mxu2 }
 0x310   :  { %v810_v37 = vadd.f32 %v1745_v31, %v809_v36 }
 0x311   :  { %v988_v40 = vpop.f32.mrf.mxu0 }
 0x312   :  { %v817_v42 = vmax.f32 %v810_v37, 0.0  ;;  %v989_v16 = vadd.f32 %v1744_v1, %v988_v40 }
 0x314   :  { %v819_v43 = vpack.c.bf16 %v817_v42, %v816_v41 }
 0x316   :  { %895 = vmatmul.bf16.vlgmr.msrb.gmra.mxu3 %v819_v43 }
 0x317   :  { %v812_v45 = vpop.f32.mrf.mxu2 }
 0x318   :  { %v813_v48 = vadd.f32 %v1745_v31, %v812_v45 }
 0x319   :  { %v990_v47 = vpop.f32.mrf.mxu0 }
 0x31a   :  { %v818_v50 = vmax.f32 %v813_v48, 0.0 }
 0x31c   :  { %v820_v51 = vpack.c.bf16 %v818_v50, %v818_v50 }
 0x31f   :  { %v814_v49 = vpop.f32.mrf.mxu2 }
 0x326   :  { %900 = vmatmul.bf16.gmra.mxu3 %v820_v51 }
 0x399   :  { %v896_v2 = vpop.f32.mrf.mxu3 }
 0x39a   :  { %v897_v3 = vadd.f32 %v1746_v0, %v896_v2 }
 0x39c   :  { %v905_v5 = vmax.f32 %v897_v3, 0.0 }
 0x39e   :  { %v992_v6 = vadd.f32 %v984_v4, %v905_v5 }
 0x3a0   :  { %v995_v7 = vpack.c.bf16 %v992_v6, %v992_v6 }
 0x3a1   :  { %v898_v8 = vpop.f32.mrf.mxu3 }
 0x3a2   :  { %v899_v9 = vadd.f32 %v1746_v0, %v898_v8  ;;  %1147 = vmatmul.bf16.vlgmr.msra.gmra.mxu2 %v995_v7 }
 0x3a4   :  { %v906_v11 = vmax.f32 %v899_v9, 0.0 }
 0x3a6   :  { %v993_v12 = vadd.f32 %v986_v10, %v906_v11 }
 0x3a8   :  { %v1012_v13 = vpack.c.bf16 %v993_v12, %v993_v12 }
 0x3a9   :  { %v901_v14 = vpop.f32.mrf.mxu3 }
 0x3aa   :  { %v902_v15 = vadd.f32 %v1746_v0, %v901_v14  ;;  %1086 = vmatmul.bf16.vlgmr.msra.gmra.mxu1 %v1012_v13 }
 0x3ac   :  { %v907_v17 = vmax.f32 %v902_v15, 0.0 }
 0x3ae   :  { %v994_v18 = vadd.f32 %v989_v16, %v907_v17 }
 0x3b0   :  { %v1152_v19 = vpack.c.bf16 %v994_v18, %v994_v18 }
 0x3b1   :  { %v903_v20 = vpop.f32.mrf.mxu3 }
 0x3b2   :  { %1226 = vmatmul.bf16.vlgmr.msra.gmra.mxu3 %v1152_v19 }
 0x425   :  { %v1148_v21 = vpop.f32.mrf.mxu2 }
 0x427   :  { %v1087_v22 = vpop.f32.mrf.mxu1 }
 0x428   :  { %v1149_v25 = vadd.f32 %v1148_v21, %v1087_v22 }
 0x42d   :  { %v1150_v23 = vpop.f32.mrf.mxu2 }
 0x42f   :  { %v1089_v24 = vpop.f32.mrf.mxu1 }
 0x435   :  { %v1227_v27 = vpop.f32.mrf.mxu3 }
 0x436   :  { %v1231_v28 = vadd.f32 %v1227_v27, %v1149_v25 }
 0x438   :  { %v1234_v29 = vadd.f32 %v1747_v26, %v1231_v28 }
 0x43a   :  { %1235 = vst [vmem:[%s2200_s12] sm:$0xff] %v1234_v29 }
 0x43d   :  { %v1229_v30 = vpop.f32.mrf.mxu3 }
 0x43e   :  { %1240 = vsyncpa [#allocation3], 1 }
 0x43f   :  { %1241 = vsyncpa [#allocation5], 1 }
 0x440   :  { %1242 = vsyncpa [#allocation8], 1 }
 0x441   :  { %1243 = vsyncpa [#allocation11], 1 }
 0x442   :  { %1244 = vsyncpa [#allocation14], 1 }
 0x443   :  { %1245 = vsyncpa [#allocation17], 1 }

</bundles_post_ra>
